<compile_context>
chip_gen: v6e
topology: v6e:2x2x1
jax: 0.10.0
libtpu: 0.0.40
codegen_flags: <defaults>
</compile_context>

<pallas_src>
import jax
import jax.numpy as jnp
from jax.experimental import pallas as pl
from jax.experimental.pallas import tpu as pltpu


LANES = 128          # lane width of a vreg
SUBLANES = 8         # sublane count of a vreg


def _kl_loss_kernel(zm_ref, zv_ref, o_ref, acc_ref):
    """One (TM, 128) tile: elementwise KL term, accumulate per-lane partials."""
    step = pl.program_id(0)

    @pl.when(step == 0)
    def _init():
        acc_ref[...] = jnp.zeros_like(acc_ref)

    zm = zm_ref[...]                                   # (TM, 128) f32
    zv = zv_ref[...]                                   # (TM, 128) f32
    # -0.5 * (1 + z_var - z_mean^2 - exp(z_var)); zero-padded tail contributes 0.
    elem = -0.5 * (1.0 + zv - zm * zm - jnp.exp(zv))
    # Sublane reduce only (cheap XLU op); keep lanes for the running accumulator.
    acc_ref[...] += jnp.sum(elem, axis=0, keepdims=True)   # (1, 128)

    @pl.when(step == pl.num_programs(0) - 1)
    def _finalize():
        # Final cross-lane reduce -> scalar -> SMEM output.
        o_ref[0, 0] = jnp.sum(acc_ref[...])


def kl_loss(z_mean, z_var, *, tile_rows=1024):
    """loss = sum(-0.5 * (1 + z_var - z_mean**2 - exp(z_var))) via one Pallas call."""
    assert z_mean.shape == z_var.shape, (z_mean.shape, z_var.shape)

    zm = z_mean.reshape(-1).astype(jnp.float32)
    zv = z_var.reshape(-1).astype(jnp.float32)
    n = zm.shape[0]

    # Lane-dense repack: (rows, 128) with rows padded to a multiple of TM (>= 8).
    rows = max((n + LANES - 1) // LANES, 1)
    tm = max(SUBLANES, min(tile_rows, ((rows + SUBLANES - 1) // SUBLANES) * SUBLANES))
    tm = ((tm + SUBLANES - 1) // SUBLANES) * SUBLANES
    rows_p = ((rows + tm - 1) // tm) * tm
    total = rows_p * LANES

    # Zero padding is exact for this formula (contributes 0 to the sum).
    zm_p = jnp.zeros((total,), jnp.float32).at[:n].set(zm).reshape(rows_p, LANES)
    zv_p = jnp.zeros((total,), jnp.float32).at[:n].set(zv).reshape(rows_p, LANES)

    grid = (rows_p // tm,)

    out = pl.pallas_call(
        _kl_loss_kernel,
        grid=grid,
        out_shape=jax.ShapeDtypeStruct((1, 1), jnp.float32),
        in_specs=[
            pl.BlockSpec((tm, LANES), lambda i: (i, 0)),
            pl.BlockSpec((tm, LANES), lambda i: (i, 0)),
        ],
        # Scalar result lives in SMEM: no masked partial vector store.
        out_specs=pl.BlockSpec(memory_space=pltpu.MemorySpace.SMEM),
        scratch_shapes=[pltpu.VMEM((1, LANES), jnp.float32)],
        compiler_params=pltpu.CompilerParams(
            # Output block is an accumulator across the whole grid -> "arbitrary".
            dimension_semantics=("arbitrary",),
        ),
    )(zm_p, zv_p)

    return out[0, 0]


if __name__ == "__main__":
    key = jax.random.PRNGKey(0)
    k_mean, k_var = jax.random.split(key)

    # Small VAE-style latent tensors: batch=2, latent dim=32 (z_var = log-variance).
    z_mean = jax.random.normal(k_mean, (2, 32), jnp.float32)
    z_var = jax.random.normal(k_var, (2, 32), jnp.float32)

    loss = jax.jit(kl_loss)(z_mean, z_var)
    loss = jax.block_until_ready(loss)

    ref = jnp.sum(-0.5 * (1.0 + z_var - z_mean ** 2 - jnp.exp(z_var)))

    assert loss.shape == (), loss.shape
    assert bool(jnp.isfinite(loss))
    assert bool(jnp.allclose(loss, ref, rtol=1e-5, atol=1e-4)), (loss, ref)
    print("KERNEL_OK")
</pallas_src>

<mosaic_0001>
module attributes {stable_mosaic.version = 11 : i64} {
  func.func @_kl_loss_kernel(%arg0: i32, %arg1: memref<8x128xf32, #tpu.memory_space<vmem>>, %arg2: memref<8x128xf32, #tpu.memory_space<vmem>>, %arg3: memref<1x1xf32, #tpu.memory_space<smem>>, %arg4: memref<1x128xf32, #tpu.memory_space<vmem>>) attributes {dimension_semantics = [#tpu.dimension_semantics<arbitrary>], iteration_bounds = array<i64: 1>, scalar_prefetch = 0 : i64, scratch_operands = 1 : i64, tpu.core_type = #tpu.core_type<tc>, window_params = [{transform_indices = @transform_0, window_bounds = array<i64: 8, 128>}, {transform_indices = @transform_1, window_bounds = array<i64: 8, 128>}, {transform_indices = @transform_2, window_bounds = array<i64: 1, 1>}]} {
    %c0_i32 = arith.constant 0 : i32
    %0 = arith.cmpi eq, %arg0, %c0_i32 : i32
    %1 = arith.extui %0 : i1 to i32
    %c0_i32_0 = arith.constant 0 : i32
    %2 = arith.cmpi ne, %1, %c0_i32_0 : i32
    scf.if %2 {
      %cst_12 = arith.constant 0.000000e+00 : f32
      %21 = vector.broadcast %cst_12 : f32 to vector<1x128xf32>
      %c0_13 = arith.constant 0 : index
      %c0_14 = arith.constant 0 : index
      %22 = vector.load %arg4[%c0_13, %c0_14] : memref<1x128xf32, #tpu.memory_space<vmem>>, vector<1x128xf32>
      tpu.vector_store %arg4[%c0_13, %c0_14], %21 {strides = array<i32>} : memref<1x128xf32, #tpu.memory_space<vmem>>, vector<1x128xf32>,
    } else {
    }
    %c0 = arith.constant 0 : index
    %c0_1 = arith.constant 0 : index
    %3 = vector.load %arg1[%c0, %c0_1] : memref<8x128xf32, #tpu.memory_space<vmem>>, vector<8x128xf32>
    %c0_2 = arith.constant 0 : index
    %c0_3 = arith.constant 0 : index
    %4 = vector.load %arg2[%c0_2, %c0_3] : memref<8x128xf32, #tpu.memory_space<vmem>>, vector<8x128xf32>
    %cst = arith.constant 1.000000e+00 : f32
    %5 = vector.broadcast %cst : f32 to vector<8x128xf32>
    %6 = arith.addf %5, %4 : vector<8x128xf32>
    %7 = arith.mulf %3, %3 : vector<8x128xf32>
    %8 = arith.subf %6, %7 : vector<8x128xf32>
    %9 = math.exp %4 : vector<8x128xf32>
    %10 = arith.subf %8, %9 : vector<8x128xf32>
    %cst_4 = arith.constant -5.000000e-01 : f32
    %11 = vector.broadcast %cst_4 : f32 to vector<8x128xf32>
    %12 = arith.mulf %11, %10 : vector<8x128xf32>
    %c0_5 = arith.constant 0 : index
    %c0_6 = arith.constant 0 : index
    %13 = vector.load %arg4[%c0_5, %c0_6] : memref<1x128xf32, #tpu.memory_space<vmem>>, vector<1x128xf32>
    %cst_7 = arith.constant dense<0.000000e+00> : vector<128xf32>
    %14 = vector.multi_reduction <add>, %12, %cst_7 [0] : vector<8x128xf32> to vector<128xf32>
    %15 = vector.shape_cast %14 : vector<128xf32> to vector<1x128xf32>
    %16 = arith.addf %13, %15 : vector<1x128xf32>
    %c0_8 = arith.constant 0 : index
    %c0_9 = arith.constant 0 : index
    %17 = vector.load %arg4[%c0_8, %c0_9] : memref<1x128xf32, #tpu.memory_space<vmem>>, vector<1x128xf32>
    tpu.vector_store %arg4[%c0_8, %c0_9], %16 {strides = array<i32>} : memref<1x128xf32, #tpu.memory_space<vmem>>, vector<1x128xf32>,
    %c0_i32_10 = arith.constant 0 : i32
    %18 = arith.cmpi eq, %arg0, %c0_i32_10 : i32
    %19 = arith.extui %18 : i1 to i32
    %c0_i32_11 = arith.constant 0 : i32
    %20 = arith.cmpi ne, %19, %c0_i32_11 : i32
    scf.if %20 {
      %c0_12 = arith.constant 0 : index
      %c0_13 = arith.constant 0 : index
      %21 = vector.load %arg4[%c0_12, %c0_13] : memref<1x128xf32, #tpu.memory_space<vmem>>, vector<1x128xf32>
      %22 = vector.shape_cast %21 : vector<1x128xf32> to vector<1x1x128xf32>
      %cst_14 = arith.constant dense<0.000000e+00> : vector<1xf32>
      %23 = vector.multi_reduction <add>, %22, %cst_14 [1, 2] : vector<1x1x128xf32> to vector<1xf32>
      %24 = vector.shape_cast %23 : vector<1xf32> to vector<1x1x1xf32>
      %25 = vector.extract %24[0, 0, 0] : f32 from vector<1x1x1xf32>
      %c0_15 = arith.constant 0 : index
      %c0_16 = arith.constant 0 : index
      %26 = memref.load %arg3[%c0_15, %c0_16] : memref<1x1xf32, #tpu.memory_space<smem>>
      memref.store %25, %arg3[%c0_15, %c0_16] : memref<1x1xf32, #tpu.memory_space<smem>>
    } else {
    }
    return
  }
  func.func @transform_0(%arg0: i32) -> (i32, i32) {
    %c0_i32 = arith.constant 0 : i32
    %c0_i32_0 = arith.constant 0 : i32
    return %arg0, %c0_i32 : i32, i32
  }
  func.func @transform_1(%arg0: i32) -> (i32, i32) {
    %c0_i32 = arith.constant 0 : i32
    %c0_i32_0 = arith.constant 0 : i32
    return %arg0, %c0_i32 : i32, i32
  }
  func.func @transform_2(%arg0: i32) -> (i32, i32) {
    %c0_i32 = arith.constant 0 : i32
    %c0_i32_0 = arith.constant 0 : i32
    %c0_i32_1 = arith.constant 0 : i32
    return %c0_i32, %c0_i32_0 : i32, i32
  }
}

</mosaic_0001>

<bundles_post_ra>
// kernel: kl_loss.1
= control target key start
LH: loop header
LB: loop body
LE: loop exit
PB: predicated region body
PF: predicated region fallthrough
CT: control target
= control target key end

     0   :  { %s107_s0 = inlined_call_operand.vmem [shape: f32[8,128], index: 0, kind: input, shape index: {}]   ;;  %s108_s1 = inlined_call_operand.vmem [shape: f32[8,128], index: 1, kind: input, shape index: {}]   ;;  %s109_s2 = inlined_call_operand.hbm [shape: f32[1,1], index: 2, kind: output, shape index: {}]  }
   0x1   :  { %v18_v0 = vld [vmem:[%s108_s1] sm:$0xff] }
   0x2   :  { %7 = vsyncpa [#allocation4], 0  ;;  %v81_v1 = vmov 0.0   ;;  %v22_v2 = vmul.f32 1.442695, %v18_v0  ;;  %v17_v3 = vld [vmem:[%s107_s0] sm:$0xff] }
   0x3   :  { %16 = vst [vmem:[#allocation2] sm:$0x1] %v81_v1  ;;  %v19_v4 = vadd.f32 1.0, %v18_v0  ;;  %v20_v5 = vmul.f32 %v17_v3, %v17_v3  ;;  %vm39_vm0 = vcmask 1040384   ;;  %s82_s1 = smov [#allocation3]  }
   0x4   :  { %69 = vpow2.f32 %v22_v2 }
   0x5   :  { %v21_v6 = vsub.f32 %v19_v4, %v20_v5 }
   0xa   :  { %v26_v15 = vld [vmem:[#allocation2] sm:$0x1] }
  0x11   :  { %v70_v7 = vpop.eup %69 }
  0x12   :  { %v24_v8 = vsub.f32 %v21_v6, %v70_v7 }
  0x14   :  { %v25_v9 = vmul.f32 -0.5, %v24_v8 }
  0x16   :  { %v27_v10 = vrot.slane %v25_v9, 4 }
  0x18   :  { %v28_v11 = vadd.f32 %v27_v10, %v25_v9 }
  0x1a   :  { %v29_v12 = vrot.slane %v28_v11, 2 }
  0x1c   :  { %v30_v13 = vadd.f32 %v29_v12, %v28_v11 }
  0x1e   :  { %v31_v14 = vrot.slane %v30_v13, 1 }
  0x20   :  { %v32_v16 = vadd.f32 %v31_v14, %v30_v13 }
  0x22   :  { %v33_v17 = vadd.f32 %v32_v16, %v26_v15 }
  0x24   :  { %34 = vst [vmem:[#allocation2] sm:$0x1] %v33_v17 }
  0x2b   :  { %v38_v18 = vld [vmem:[#allocation2] sm:$0x1] }
  0x2c   :  { %v40_v19 = vsel %vm39_vm0, %v38_v18, 0.0 }
  0x2d   :  { %41 = vadd.xlane.f32.xlu0 %v40_v19 }
  0xb6   :  { %v42_v20 = vpop.xlane.xlu0 %41 }
  0xb7   :  { %v43_v21 = vrot.slane %v42_v20, 4 }
  0xb9   :  { %v44_v22 = vadd.f32 %v43_v21, %v42_v20 }
  0xbb   :  { %v45_v23 = vrot.slane %v44_v22, 2 }
  0xbd   :  { %v46_v24 = vadd.f32 %v45_v23, %v44_v22 }
  0xbf   :  { %v47_v25 = vrot.slane %v46_v24, 1 }
  0xc1   :  { %v48_v26 = vadd.f32 %v47_v25, %v46_v24 }
  0xc3   :  { %65 = vpush %v48_v26 }
  0xf4   :  { %s66_s0 = spop %65 }
  0xf5   :  { %51 = sst [smem:[#allocation3]] %s66_s0 }
  0xf6   :  { %59 = dma.smem_to_hbm %s82_s1, 16, %s109_s2, [#allocation4]  }
  0xf7   :  { %79 = dma.done.wait [#allocation4], 16  }
  0xf8   :  { %80 = vsyncadd [#allocation4], 4294967280 }
  0xf9   :  { %63 = sfence }
  0xfa   :  { %64 = vsyncpa [#allocation4], 1 }

</bundles_post_ra>
